<compile_context>
chip_gen: v5e
topology: v5e:2x2
jax: 0.10.0
libtpu: 0.0.40
codegen_flags: <defaults>
</compile_context>

<pallas_src>
import math

import jax
import jax.numpy as jnp
from jax.experimental import pallas as pl
from jax.experimental.pallas import tpu as pltpu


def _concept_encoding_kernel(qa_ref, emb_ref, out_ref):
    # qa_ref : (tm, Ck) tile of the (folded) flattened relation tensor
    # emb_ref: (Ck, Dk) (block-diagonal) embedding table, resident every step
    # out_ref: (tm, Dk) output tile
    out_ref[...] = jnp.dot(
        qa_ref[...], emb_ref[...], preferred_element_type=jnp.float32
    ).astype(out_ref.dtype)


def _round_up(x, m):
    return ((x + m - 1) // m) * m


def _sublane(dtype):
    """Sublane multiple for a dtype (8 for f32, 16 for bf16, 32 for int8/fp8)."""
    return max(8, 32 // jnp.dtype(dtype).itemsize)


def _tpu_generation_params():
    """Per-generation sizing: (tile budget, scoped-VMEM cap, min grid steps, max fold)."""
    kind = ""
    try:
        kind = jax.devices()[0].device_kind.lower()
    except Exception:
        pass
    vmem_phys = None
    try:  # refine with the real VMEM capacity when the query is available
        vmem_phys = int(pltpu.get_tpu_info().vmem_capacity_bytes)
    except Exception:
        vmem_phys = None

    if "v7" in kind or "tpu7" in kind:
        # 64 MiB physical VMEM per TC, 2 TCs/chip -> small tiles, >=2 steps/core.
        budget, limit_cap, min_steps, max_fold = 28 << 20, 40 << 20, 4, 32
    elif "v6" in kind:
        budget, limit_cap, min_steps, max_fold = 56 << 20, 96 << 20, 2, 32
    elif "v5" in kind and ("lite" in kind or "5e" in kind):
        # Same 128 MiB VMEM as v6e, but cap the fold so kron-inflated MXU work
        # cannot flip the roofline regime on the slower MXU.
        budget, limit_cap, min_steps, max_fold = 56 << 20, 96 << 20, 2, 8
    else:
        # Unknown / other generations: stay conservative.
        budget, limit_cap, min_steps, max_fold = 28 << 20, 48 << 20, 2, 8

    if vmem_phys:
        budget = min(budget, int(0.45 * vmem_phys))
        limit_cap = min(limit_cap, int(0.75 * vmem_phys))
    return budget, limit_cap, min_steps, max_fold


def _choose_fold(M, C, D, itemsize, *, max_fold, budget):
    """Row-folding factor that makes the matmul lane-dense.

    Folding f rows of (M, C) into (M // f, f*C) and multiplying by the
    block-diagonal kron(I_f, emb) of shape (f*C, f*D) yields (M // f, f*D),
    whose row-major memory layout matches the unfolded (M, D) result.
    Constraints: f*C <= 256 (one MXU pass), the padded double-buffered kron'd
    table must leave room for row tiles, M % f == 0, and f <= max_fold
    (generation gate). Prefer lane-dense loads AND stores; fall back to
    lane-dense stores only; else no fold.
    """
    if max_fold <= 1:
        return 1
    f_out = 128 // math.gcd(D, 128)          # makes f*D a multiple of 128 (dense stores)
    f_in = 128 // math.gcd(C, 128)           # makes f*C a multiple of 128 (dense loads)
    for f in (math.lcm(f_in, f_out), f_out):
        if f <= 1 or f > max_fold or M % f != 0:
            continue
        if f * C > 256:                      # keep folded K within MXU depth
            continue
        emb_bytes = 2 * _round_up(f * C, 8) * _round_up(f * D, 128) * itemsize
        if emb_bytes > budget // 2:          # double-buffered resident table
            continue
        return f
    return 1


def _padded_tile_bytes(rows, Ck, Dk, in_dtype, out_dtype, sub):
    """VMEM bytes for one grid step, including lane/sublane padding and the
    double-buffering of the input tile, output tile and resident embedding."""
    in_it = jnp.dtype(in_dtype).itemsize
    out_it = jnp.dtype(out_dtype).itemsize
    rows_p = _round_up(max(rows, 1), sub)
    ck_l = _round_up(Ck, 128)
    dk_l = _round_up(Dk, 128)
    in_tile = rows_p * ck_l * in_it
    out_tile = rows_p * dk_l * out_it
    emb_tile = _round_up(Ck, sub) * dk_l * in_it
    return 2 * (in_tile + out_tile + emb_tile)


def concept_encoding(qa_relation, concept_embeddings, *, tm=None, out_dtype=None,
                     use_xla_for_tiny=False):
    """qa_relation: [B, T1, T2, C]; concept_embeddings: [C, D] -> [B, T1, T2, D]."""
    B, T1, T2, C = qa_relation.shape
    C2, D = concept_embeddings.shape
    assert C == C2, "num_concepts mismatch"

    out_dtype = qa_relation.dtype if out_dtype is None else jnp.dtype(out_dtype)
    M = B * T1 * T2

    # Optional tiny-problem fast path (disabled by default so tests always
    # exercise the Pallas path).
    if use_xla_for_tiny and M * max(C, D) < 65536:
        return jnp.matmul(qa_relation, concept_embeddings).astype(out_dtype)

    budget, limit_cap, min_steps, max_fold = _tpu_generation_params()

    qa_flat = qa_relation.reshape(M, C)
    emb = concept_embeddings
    in_itemsize = jnp.dtype(qa_flat.dtype).itemsize
    out_itemsize = jnp.dtype(out_dtype).itemsize

    fold = _choose_fold(M, C, D, in_itemsize, max_fold=max_fold, budget=budget)
    if fold > 1:
        # TODO(synk): verify in HLO that these reshapes stay copy-free under
        # tiled HBM layouts for very narrow C.
        qa_flat = qa_flat.reshape(M // fold, fold * C)          # row-major grouping
        emb = jnp.kron(jnp.eye(fold, dtype=emb.dtype), emb)     # block-diag (f*C, f*D)

    Mk, Ck = qa_flat.shape
    Dk = emb.shape[1]
    sub = max(_sublane(qa_flat.dtype), _sublane(out_dtype))

    # Largest row tile whose padding-aware, double-buffered footprint fits the budget.
    per_row = 2 * (_round_up(Ck, 128) * in_itemsize + _round_up(Dk, 128) * out_itemsize)
    emb_resident = 2 * _round_up(Ck, sub) * _round_up(Dk, 128) * in_itemsize
    avail = max(budget - emb_resident, sub * per_row)
    tm_max = max(sub, (avail // per_row) // sub * sub)

    tm_eff = tm_max if tm is None else max(sub, min(int(tm) // sub * sub, tm_max))
    if tm_eff >= Mk:
        tm_eff = Mk                      # full extent: always layout-legal, no masked rows
    # Keep >= min_steps grid steps (>= 2 per TensorCore on v7x) when there is
    # enough work, so megacore sharding and DMA prefetch/writeback overlap.
    if Mk >= min_steps * sub and pl.cdiv(Mk, tm_eff) < min_steps:
        tm_eff = min(Mk, max(sub, _round_up(pl.cdiv(Mk, min_steps), sub)))

    tile_bytes = _padded_tile_bytes(tm_eff, Ck, Dk, qa_flat.dtype, out_dtype, sub)
    vmem_limit = int(min(limit_cap, max(32 << 20, int(1.25 * tile_bytes))))

    cost = pl.CostEstimate(
        flops=2 * Mk * Ck * Dk,
        transcendentals=0,
        bytes_accessed=(Mk * Ck * in_itemsize
                        + Ck * Dk * in_itemsize
                        + Mk * Dk * out_itemsize),
    )

    out_flat = pl.pallas_call(
        _concept_encoding_kernel,
        out_shape=jax.ShapeDtypeStruct((Mk, Dk), out_dtype),
        grid_spec=pltpu.PrefetchScalarGridSpec(
            num_scalar_prefetch=0,
            grid=(pl.cdiv(Mk, tm_eff),),        # ragged last block: no input pad
            in_specs=[
                pl.BlockSpec((tm_eff, Ck), lambda i: (i, 0)),
                pl.BlockSpec((Ck, Dk), lambda i: (0, 0)),   # resident table
            ],
            out_specs=pl.BlockSpec((tm_eff, Dk), lambda i: (i, 0)),
        ),
        compiler_params=pltpu.CompilerParams(
            dimension_semantics=("parallel",),
            vmem_limit_bytes=vmem_limit,
        ),
        cost_estimate=cost,
    )(qa_flat, emb)

    # (Mk, Dk) has the same row-major element order as (M, D).
    return out_flat.reshape(B, T1, T2, D)


if __name__ == "__main__":
    key = jax.random.PRNGKey(0)
    k1, k2, k3, k4, k5, k6 = jax.random.split(key, 6)

    # Case A: module defaults (num_concepts=5, embd_dim=300). On v6e/v7x this
    # takes the lane-folded path (fold=32, K=160 <= 256, lane-dense stores).
    B, T1, T2 = 2, 8, 8
    C_a, D_a = 5, 300
    qa_a = jax.random.uniform(k1, (B, T1, T2, C_a), dtype=jnp.float32)
    emb_a = jax.random.normal(k2, (C_a, D_a), dtype=jnp.float32)
    out_a = jax.block_until_ready(concept_encoding(qa_a, emb_a))
    ref_a = jnp.matmul(qa_a, emb_a)
    assert out_a.shape == (B, T1, T2, D_a)
    assert jnp.allclose(out_a, ref_a, atol=1e-4, rtol=1e-4), "case A mismatch"

    # Case B: 128-friendly C/D -> fold=8, lane-dense loads AND stores.
    C_b, D_b = 16, 32
    qa_b = jax.random.uniform(k3, (B, T1, T2, C_b), dtype=jnp.float32)
    emb_b = jax.random.normal(k4, (C_b, D_b), dtype=jnp.float32)
    out_b = jax.block_until_ready(concept_encoding(qa_b, emb_b))
    ref_b = jnp.matmul(qa_b, emb_b)
    assert out_b.shape == (B, T1, T2, D_b)
    assert jnp.allclose(out_b, ref_b, atol=1e-4, rtol=1e-4), "case B mismatch"

    # Case C: bf16 output (halves the dominant M*D store); f32 MXU accumulation.
    out_c = jax.block_until_ready(concept_encoding(qa_b, emb_b, out_dtype=jnp.bfloat16))
    assert out_c.dtype == jnp.bfloat16
    assert jnp.allclose(out_c.astype(jnp.float32), ref_b, atol=5e-2, rtol=5e-2), "case C mismatch"

    # Case D: module-default C/D with odd M (no fold possible) and a forced
    # small tile -> multi-step grid with a ragged last block (masked writes),
    # exercising the narrow-C unfolded path.
    qa_d = jax.random.uniform(k5, (2, 9, 7, C_a), dtype=jnp.float32)
    emb_d = jax.random.normal(k6, (C_a, D_a), dtype=jnp.float32)
    out_d = jax.block_until_ready(concept_encoding(qa_d, emb_d, tm=64))
    ref_d = jnp.matmul(qa_d, emb_d)
    assert out_d.shape == (2, 9, 7, D_a)
    assert jnp.allclose(out_d, ref_d, atol=1e-4, rtol=1e-4), "case D mismatch"

    print("KERNEL_OK")
</pallas_src>

<mosaic_0001>
module attributes {stable_mosaic.version = 11 : i64} {
  func.func @_concept_encoding_kernel(%arg0: i32, %arg1: memref<64x5xf32, #tpu.memory_space<vmem>>, %arg2: memref<5x300xf32, #tpu.memory_space<vmem>>, %arg3: memref<64x300xf32, #tpu.memory_space<vmem>>) attributes {dimension_semantics = [#tpu.dimension_semantics<parallel>], iteration_bounds = array<i64: 2>, scalar_prefetch = 0 : i64, scratch_operands = 0 : i64, tpu.core_type = #tpu.core_type<tc>, window_params = [{transform_indices = @transform_0, window_bounds = array<i64: 64, 5>}, {pipeline_mode = #tpu.pipeline_mode<synchronous>, transform_indices = @transform_1, window_bounds = array<i64: 5, 300>}, {transform_indices = @transform_2, window_bounds = array<i64: 64, 300>}]} {
    %c0 = arith.constant 0 : index
    %c0_0 = arith.constant 0 : index
    %0 = vector.load %arg1[%c0, %c0_0] : memref<64x5xf32, #tpu.memory_space<vmem>>, vector<64x5xf32>
    %c0_1 = arith.constant 0 : index
    %c0_2 = arith.constant 0 : index
    %1 = vector.load %arg2[%c0_1, %c0_2] : memref<5x300xf32, #tpu.memory_space<vmem>>, vector<5x300xf32>
    %cst = arith.constant dense<0.000000e+00> : vector<64x300xf32>
    %2 = tpu.matmul %0, %1, %cst {dimension_numbers = #tpu.dot_dimension_numbers<[1], [0], [0], [1], [0, 0, 1, 1], [], []>} : vector<64x5xf32>, vector<5x300xf32>, vector<64x300xf32> -> vector<64x300xf32>
    %c0_3 = arith.constant 0 : index
    %c0_4 = arith.constant 0 : index
    %3 = vector.load %arg3[%c0_3, %c0_4] : memref<64x300xf32, #tpu.memory_space<vmem>>, vector<64x300xf32>
    tpu.vector_store %arg3[%c0_3, %c0_4], %2 {strides = array<i32>} : memref<64x300xf32, #tpu.memory_space<vmem>>, vector<64x300xf32>,
    return
  }
  func.func @transform_0(%arg0: i32) -> (i32, i32) {
    %c0_i32 = arith.constant 0 : i32
    %c0_i32_0 = arith.constant 0 : i32
    return %arg0, %c0_i32 : i32, i32
  }
  func.func @transform_1(%arg0: i32) -> (i32, i32) {
    %c0_i32 = arith.constant 0 : i32
    %c0_i32_0 = arith.constant 0 : i32
    %c0_i32_1 = arith.constant 0 : i32
    return %c0_i32, %c0_i32_0 : i32, i32
  }
  func.func @transform_2(%arg0: i32) -> (i32, i32) {
    %c0_i32 = arith.constant 0 : i32
    %c0_i32_0 = arith.constant 0 : i32
    return %arg0, %c0_i32 : i32, i32
  }
}

</mosaic_0001>

<bundles_post_ra>
// kernel: tpu_custom_call.1
= control target key start
LH: loop header
LB: loop body
LE: loop exit
PB: predicated region body
PF: predicated region fallthrough
CT: control target
= control target key end

     0   :  { %s474_s9 = smov 0   ;;  %s568_s0 = inlined_call_operand.vmem [shape: f32[128,5], index: 0, kind: input, shape index: {}]   ;;  %s569_s1 = inlined_call_operand.vmem [shape: f32[5,300], index: 1, kind: input, shape index: {}]   ;;  %s570_s2 = inlined_call_operand.vmem [shape: f32[128,300], index: 2, kind: output, shape index: {}]  }
   0x1 LB: > { %s401_s10 = sadd.s32 4294967295, %s457_s9   ;;  %p405_p0 = scmp.ge.s32.totalorder %s457_s9, 1  ;;  %s457_s9 = sphi %s474_s9, %s12_s9  }
   0x2   : > { %p113_p1 = scmp.lt.s32.totalorder %s457_s9, 3 }
   0x4   : > { %p114_p2 = pnand %p405_p0, %p113_p1 }
   0x5   : > { %s406_s15 = sshll.u32 (!%p114_p2), %s401_s10, 3 }
   0x6   : > { %117 = sbr.rel (%p114_p2) target bundleno = 189 (0xbd), region = 28  ;;  %p137_p3 = scmp.lt.s32.totalorder (!%p114_p2), %s406_s15, 15 }
   0xb   : > { %v157_v0 = vld [vmem:[%s569_s1] sm:$0x1f]  ;;  %vm185_vm0 = vcmask 1044480   ;;  %v159_v1 = vld [vmem:[%s569_s1 + $0x10] sm:$0x1f]  ;;  %s572_s15 = smov (!%p137_p3, %s406_s15), 15 }
   0xc   : > { %439 = vmatpush.msk.msra.mxu3 %vm185_vm0, %v157_v0  ;;  %428 = vmatpush.msk.msra.mxu2 %vm185_vm0, %v159_v1  ;;  %v158_v2 = vld [vmem:[%s569_s1 + $0x8] sm:$0x1f]  ;;  %s407_s18 = sshll.u32 %s572_s15, 3  ;;  %vm160_vm1 = vcmask 39936   ;;  %s442_s22 = smul.u32 24, %s572_s15  ;;  %vm320_vm2 = vcmask 359424  }
   0xd   : > { %410 = vmatpush.msk.msra.mxu0 %vm185_vm0, %v157_v0  ;;  %419 = vmatpush.msk.msra.mxu1 %vm185_vm0, %v158_v2  ;;  %s140_s21 = scalar_lea.vmem %s568_s0, %s407_s18 }
   0xe   : > { %440 = vmatpush.msk.msrb.mxu3 %vm185_vm0, %v158_v2  ;;  %v155_v3 = vld [vmem:[%s140_s21 + $0x30] sm:$0xff]  ;;  %v149_v4 = vld [vmem:[%s140_s21] sm:$0xff]  ;;  %v156_v5 = vld [vmem:[%s140_s21 + $0x38] sm:$0xff]  ;;  %s531_s25 = scalar_lea.vmem %s570_s2, %s442_s22 }
   0xf   : > { %417 = vmatmul.msk.f32.vlgmr.msra.gmra.mxu3 %vm160_vm1, %v155_v3  ;;  %429 = vmatmul.msk.f32.vlgmr.msra.gmra.mxu2 %vm160_vm1, %v149_v4  ;;  %v150_v6 = vld [vmem:[%s140_s21 + $0x8] sm:$0xff]  ;;  %v151_v7 = vld [vmem:[%s140_s21 + $0x10] sm:$0xff]  ;;  %v152_v8 = vld [vmem:[%s140_s21 + $0x18] sm:$0xff] }
  0x10   : > { %411 = vmatmul.msk.f32.vlgmr.msra.gmra.mxu0 %vm160_vm1, %v149_v4  ;;  %420 = vmatmul.msk.f32.vlgmr.msra.gmra.mxu1 %vm160_vm1, %v149_v4  ;;  %v153_v9 = vld [vmem:[%s140_s21 + $0x20] sm:$0xff]  ;;  %v154_v10 = vld [vmem:[%s140_s21 + $0x28] sm:$0xff] }
  0x11   : > { %441 = vmatpush.msk.msra.mxu3 %vm185_vm0, %v159_v1 }
  0x17   : > { %418 = vmatmul.msk.f32.gmra.mxu3 %vm160_vm1, %v156_v5  ;;  %430 = vmatmul.msk.f32.gmra.mxu2 %vm160_vm1, %v150_v6 }
  0x18   : > { %412 = vmatmul.msk.f32.gmra.mxu0 %vm160_vm1, %v150_v6  ;;  %421 = vmatmul.msk.f32.gmra.mxu1 %vm160_vm1, %v150_v6 }
  0x1f   : > { %426 = vmatmul.msk.f32.vlgmr.msrb.gmra.mxu3 %vm160_vm1, %v155_v3  ;;  %431 = vmatmul.msk.f32.gmra.mxu2 %vm160_vm1, %v151_v7 }
  0x20   : > { %413 = vmatmul.msk.f32.gmra.mxu0 %vm160_vm1, %v151_v7  ;;  %422 = vmatmul.msk.f32.gmra.mxu1 %vm160_vm1, %v151_v7 }
  0x27   : > { %427 = vmatmul.msk.f32.gmra.mxu3 %vm160_vm1, %v156_v5  ;;  %432 = vmatmul.msk.f32.gmra.mxu2 %vm160_vm1, %v152_v8 }
  0x28   : > { %414 = vmatmul.msk.f32.gmra.mxu0 %vm160_vm1, %v152_v8  ;;  %423 = vmatmul.msk.f32.gmra.mxu1 %vm160_vm1, %v152_v8 }
  0x2f   : > { %433 = vmatmul.msk.f32.gmra.mxu2 %vm160_vm1, %v153_v9  ;;  %435 = vmatmul.msk.f32.vlgmr.msra.gmra.mxu3 %vm160_vm1, %v155_v3 }
  0x30   : > { %415 = vmatmul.msk.f32.gmra.mxu0 %vm160_vm1, %v153_v9  ;;  %424 = vmatmul.msk.f32.gmra.mxu1 %vm160_vm1, %v153_v9 }
  0x37   : > { %434 = vmatmul.msk.f32.gmra.mxu2 %vm160_vm1, %v154_v10  ;;  %436 = vmatmul.msk.f32.gmra.mxu3 %vm160_vm1, %v156_v5 }
  0x38   : > { %416 = vmatmul.msk.f32.gmra.mxu0 %vm160_vm1, %v154_v10  ;;  %425 = vmatmul.msk.f32.gmra.mxu1 %vm160_vm1, %v154_v10 }
  0x8d   : > { %v212_v11 = vpop.f32.mrf.mxu0  ;;  %v253_v12 = vpop.f32.mrf.mxu1 }
  0x8e   : > { %318 = vst [vmem:[%s531_s25] sm:$0xff] %v212_v11 }
  0x8f   : > { %319 = vst [vmem:[%s531_s25 + $0x8] sm:$0xff] %v253_v12 }
  0x92   : > { %v230_v13 = vpop.f32.mrf.mxu3  ;;  %v294_v14 = vpop.f32.mrf.mxu2 }
  0x93   : > { %337 = vst [vmem:[%s531_s25 + $0x90] sm:$0xff] %v230_v13 }
  0x94   : > { %321 = vst.msk [vmem:[%s531_s25 + $0x10] sm:$0xff] %vm320_vm2, %v294_v14 }
  0x95   : > { %v215_v15 = vpop.f32.mrf.mxu0  ;;  %v256_v16 = vpop.f32.mrf.mxu1 }
  0x96   : > { %322 = vst [vmem:[%s531_s25 + $0x18] sm:$0xff] %v215_v15 }
  0x97   : > { %323 = vst [vmem:[%s531_s25 + $0x20] sm:$0xff] %v256_v16 }
  0x9a   : > { %v233_v17 = vpop.f32.mrf.mxu3  ;;  %v297_v18 = vpop.f32.mrf.mxu2 }
  0x9b   : > { %340 = vst [vmem:[%s531_s25 + $0xa8] sm:$0xff] %v233_v17 }
  0x9c   : > { %324 = vst.msk [vmem:[%s531_s25 + $0x28] sm:$0xff] %vm320_vm2, %v297_v18 }
  0x9d   : > { %v218_v19 = vpop.f32.mrf.mxu0  ;;  %v259_v20 = vpop.f32.mrf.mxu1 }
  0x9e   : > { %325 = vst [vmem:[%s531_s25 + $0x30] sm:$0xff] %v218_v19 }
  0x9f   : > { %326 = vst [vmem:[%s531_s25 + $0x38] sm:$0xff] %v259_v20 }
  0xa2   : > { %v271_v21 = vpop.f32.mrf.mxu3  ;;  %v300_v22 = vpop.f32.mrf.mxu2 }
  0xa3   : > { %338 = vst [vmem:[%s531_s25 + $0x98] sm:$0xff] %v271_v21 }
  0xa4   : > { %327 = vst.msk [vmem:[%s531_s25 + $0x40] sm:$0xff] %vm320_vm2, %v300_v22 }
  0xa5   : > { %v221_v23 = vpop.f32.mrf.mxu0  ;;  %v262_v24 = vpop.f32.mrf.mxu1 }
  0xa6   : > { %328 = vst [vmem:[%s531_s25 + $0x48] sm:$0xff] %v221_v23 }
  0xa7   : > { %329 = vst [vmem:[%s531_s25 + $0x50] sm:$0xff] %v262_v24 }
  0xaa   : > { %v274_v25 = vpop.f32.mrf.mxu3  ;;  %v303_v26 = vpop.f32.mrf.mxu2 }
  0xab   : > { %341 = vst [vmem:[%s531_s25 + $0xb0] sm:$0xff] %v274_v25 }
  0xac   : > { %330 = vst.msk [vmem:[%s531_s25 + $0x58] sm:$0xff] %vm320_vm2, %v303_v26 }
  0xad   : > { %v224_v27 = vpop.f32.mrf.mxu0  ;;  %v265_v28 = vpop.f32.mrf.mxu1 }
  0xae   : > { %331 = vst [vmem:[%s531_s25 + $0x60] sm:$0xff] %v224_v27 }
  0xaf   : > { %332 = vst [vmem:[%s531_s25 + $0x68] sm:$0xff] %v265_v28 }
  0xb2   : > { %v306_v29 = vpop.f32.mrf.mxu2  ;;  %v312_v30 = vpop.f32.mrf.mxu3 }
  0xb3   : > { %333 = vst.msk [vmem:[%s531_s25 + $0x70] sm:$0xff] %vm320_vm2, %v306_v29 }
  0xb4   : > { %339 = vst.msk [vmem:[%s531_s25 + $0xa0] sm:$0xff] %vm320_vm2, %v312_v30 }
  0xb5   : > { %v227_v31 = vpop.f32.mrf.mxu0  ;;  %v268_v32 = vpop.f32.mrf.mxu1 }
  0xb6   : > { %334 = vst [vmem:[%s531_s25 + $0x78] sm:$0xff] %v227_v31 }
  0xb7   : > { %335 = vst [vmem:[%s531_s25 + $0x80] sm:$0xff] %v268_v32 }
  0xba   : > { %v309_v33 = vpop.f32.mrf.mxu2  ;;  %v315_v34 = vpop.f32.mrf.mxu3 }
  0xbb   : > { %336 = vst.msk [vmem:[%s531_s25 + $0x88] sm:$0xff] %vm320_vm2, %v309_v33 }
  0xbc   : > { %342 = vst.msk [vmem:[%s531_s25 + $0xb8] sm:$0xff] %vm320_vm2, %v315_v34 }
  0xbd PF: > { %s12_s9 = sadd.s32 1, %s457_s9  }
  0xbe   : > { %p9_p4 = scmp.ge.s32.totalorder %s12_s9, 4  }
  0xc0   :  { %11 = sbr.rel (!%p9_p4) target bundleno = 1 (0x1), region = 58 }

</bundles_post_ra>
